<compile_context>
chip_gen: v7x
topology: tpu7x:2x2x1
jax: 0.10.0
libtpu: 0.0.40
codegen_flags: <defaults>
</compile_context>

<pallas_src>
import jax
import jax.numpy as jnp
import numpy as np
from jax import lax
from jax.experimental import pallas as pl
from jax.experimental.pallas import tpu as pltpu


def unet_up_kernel(p_ref, w_ref, scale_ref, shift_ref, o_ref):
    # p_ref: (tm, K_pad) bf16 window-patches; w_ref: (K_pad, tn) bf16 conv weights;
    # scale_ref/shift_ref: (1, tn) f32 folded BatchNorm scale / shift.
    acc = jnp.dot(p_ref[...], w_ref[...], preferred_element_type=jnp.float32)
    o_ref[...] = jnp.maximum(acc * scale_ref[...] + shift_ref[...], 0.0).astype(o_ref.dtype)


def unet_up_forward(x, skip, w, gamma, beta, run_mean, run_var, eps=1e-5, tm=1024):
    """x: [N, Cin, Hin, Win] (NCHW), skip: [N, Cskip, 2*Hin, 2*Win],
       w: [Cin, Cout, 4, 4] (PyTorch ConvTranspose2d weight layout)."""
    N, Cin, Hin, Win = x.shape
    Cout = w.shape[1]
    Hout, Wout = 2 * Hin, 2 * Win

    # ---- padded sizes: lane/MXU friendly on v5e (128) and v6e/v7x (256) ------------------
    Cout_p = ((Cout + 63) // 64) * 64           # 4*Cout_p is a multiple of 256
    Ncols = 4 * Cout_p
    K = 4 * Cin
    K_pad = ((K + 127) // 128) * 128            # aligned bf16 loads on the contraction dim

    # ---- dense sub-pixel patches: 2x2 windows of the 1-padded input (bf16) ---------------
    # TODO(synk): for small-Cin mem-bound stages, build these 4 column groups in-kernel from
    # two row-shifted BlockSpecs + pltpu.roll instead of materializing a 4x-inflated P.
    x_nhwc = x.transpose(0, 2, 3, 1)                          # [N, Hin, Win, Cin]
    xp = jnp.pad(x_nhwc, ((0, 0), (1, 1), (1, 1), (0, 0)))
    P = jnp.concatenate(
        [xp[:, dh:dh + Hin + 1, dw:dw + Win + 1, :] for dh in (0, 1) for dw in (0, 1)],
        axis=-1)                                              # [N, Hin+1, Win+1, 4*Cin]
    M = N * (Hin + 1) * (Win + 1)
    P = P.reshape(M, K)

    # ---- weight matrix: rows (dh, dw, ci), cols (p, q, co); BN kept in f32 epilogue ------
    # Phase p uses kernel taps kh = 3 (window row 0) / kh = 1 (window row 1) for p = 0 and
    # kh = 2 / kh = 0 for p = 1 (same mapping for kw / q).
    scale_vec = gamma / jnp.sqrt(run_var + eps)
    shift_vec = beta - run_mean * scale_vec
    kidx = jnp.array([[3, 1], [2, 0]], dtype=jnp.int32)       # [phase, window offset]
    wt = w[:, :, kidx[:, :, None, None], kidx[None, None, :, :]]   # [ci, co, p, dh, q, dw]
    wt = wt.transpose(3, 5, 0, 2, 4, 1)                            # [dh, dw, ci, p, q, co]
    wt = jnp.pad(wt, ((0, 0),) * 5 + ((0, Cout_p - Cout),))
    wmat = wt.reshape(K, Ncols)
    wmat = jnp.pad(wmat, ((0, K_pad - K), (0, 0))).astype(jnp.bfloat16)

    scale = jnp.tile(jnp.pad(scale_vec, (0, Cout_p - Cout)), 4).reshape(1, Ncols)
    scale = scale.astype(jnp.float32)
    shift = jnp.tile(jnp.pad(shift_vec, (0, Cout_p - Cout)), 4).reshape(1, Ncols)
    shift = shift.astype(jnp.float32)

    # ---- tile sizes -----------------------------------------------------------------------
    if Ncols <= 1024:
        tn = Ncols
    elif Ncols % 1024 == 0:
        tn = 1024
    elif Ncols % 512 == 0:
        tn = 512
    else:
        tn = 256

    # At least 2 grid steps along M (pipelining + megacore), tm a multiple of 16 (bf16 tiles).
    steps = max(2, pl.cdiv(M, tm))
    tm = max(16, pl.cdiv(pl.cdiv(M, steps), 16) * 16)

    def _budget(tm_, tn_):
        w_bufs = 1 if tn_ == Ncols else 2
        p_bufs = 3 if (K_pad <= 512 and pl.cdiv(M, tm_) >= 3) else 2
        return (p_bufs * tm_ * K_pad * 2            # activation buffers (bf16)
                + w_bufs * K_pad * tn_ * 2          # weight buffers (bf16)
                + 2 * w_bufs * tn_ * 4              # scale + shift (f32)
                + 2 * tm_ * tn_ * 2)                # double-buffered bf16 output

    VMEM_BUDGET = 40 << 20                          # leaves headroom on v7x's 64 MiB/TC
    while _budget(tm, tn) > VMEM_BUDGET and tn > 256 and Ncols % (tn // 2) == 0:
        tn //= 2
    while _budget(tm, tn) > VMEM_BUDGET and tm > 16:
        tm = max(16, ((tm // 2) // 16) * 16)
    # TODO(synk): for extreme Cin where even (K_pad, 256) weight blocks blow VMEM, add a K
    # grid axis ('arbitrary', last) with an f32 VMEM accumulator.

    Mp = pl.cdiv(M, tm) * tm
    grid_m, grid_n = Mp // tm, Ncols // tn
    p_bufs = 3 if (K_pad <= 512 and grid_m >= 3) else 2
    vmem_limit = int(min(64 << 20, max(16 << 20, int(1.5 * _budget(tm, tn)) + (2 << 20))))

    P = jnp.pad(P, ((0, Mp - M), (0, K_pad - K))).astype(jnp.bfloat16)

    # ---- BlockSpecs: resident activation across the inner N axis; single-buffered consts --
    p_kwargs = dict(pipeline_mode=pl.Buffered(3)) if p_bufs == 3 else {}
    const_kwargs = dict(pipeline_mode=pl.Buffered(1)) if grid_n == 1 else {}
    in_specs = [
        pl.BlockSpec((tm, K_pad), lambda i, j: (i, 0), **p_kwargs),
        pl.BlockSpec((K_pad, tn), lambda i, j: (0, j), **const_kwargs),
        pl.BlockSpec((1, tn), lambda i, j: (0, j), **const_kwargs),
        pl.BlockSpec((1, tn), lambda i, j: (0, j), **const_kwargs),
    ]
    out_spec = pl.BlockSpec((tm, tn), lambda i, j: (i, j))

    w_reads = 1 if grid_n == 1 else grid_m
    cost = pl.CostEstimate(
        flops=2 * Mp * K_pad * Ncols,
        transcendentals=0,
        bytes_accessed=int(Mp * K_pad * 2 + w_reads * K_pad * Ncols * 2
                           + 2 * Ncols * 4 * 2 + Mp * Ncols * 2))

    Z = pl.pallas_call(
        unet_up_kernel,
        out_shape=jax.ShapeDtypeStruct((Mp, Ncols), jnp.bfloat16),
        grid_spec=pltpu.PrefetchScalarGridSpec(
            num_scalar_prefetch=0,
            grid=(grid_m, grid_n),
            in_specs=in_specs,
            out_specs=out_spec),
        compiler_params=pltpu.CompilerParams(
            dimension_semantics=("parallel", "parallel"),
            vmem_limit_bytes=vmem_limit),
        cost_estimate=cost,
    )(P, wmat, scale, shift)

    # ---- pixel shuffle (pure gather, no overlap-add), back to NCHW, concat skip ----------
    Z = Z[:M].reshape(N, Hin + 1, Win + 1, 2, 2, Cout_p)
    phases = [[Z[:, p:p + Hin, q:q + Win, p, q, :Cout] for q in (0, 1)] for p in (0, 1)]
    y = jnp.stack([jnp.stack(row, axis=3) for row in phases], axis=2)  # [N,Hin,2,Win,2,Co]
    y = y.reshape(N, Hout, Wout, Cout).transpose(0, 3, 1, 2).astype(x.dtype)  # NCHW
    # Dropout(0.2): inference semantics -> identity.
    # TODO(synk): training-mode stochastic dropout mask not implemented.
    return jnp.concatenate([y, skip], axis=1)


def reference(x, skip, w, gamma, beta, rm, rv, eps=1e-5):
    # Pure-JAX reference: ConvTranspose2d via lhs-dilated conv with flipped kernel.
    # Inputs quantized to bf16 (same operand precision as the kernel path), f32 accumulate.
    xq = x.astype(jnp.bfloat16).astype(jnp.float32)
    wq = w.astype(jnp.bfloat16).astype(jnp.float32)
    wc = jnp.flip(wq, axis=(2, 3)).transpose(1, 0, 2, 3)      # [Cout, Cin, kH, kW]
    y = lax.conv_general_dilated(
        xq, wc, window_strides=(1, 1), padding=((2, 2), (2, 2)),
        lhs_dilation=(2, 2), dimension_numbers=("NCHW", "OIHW", "NCHW"))
    y = ((y - rm[None, :, None, None]) / jnp.sqrt(rv + eps)[None, :, None, None]
         * gamma[None, :, None, None] + beta[None, :, None, None])
    y = jnp.maximum(y, 0.0)
    return jnp.concatenate([y, skip], axis=1)


if __name__ == "__main__":
    in_size, out_size = 4, 4
    N, Hin, Win = 2, 8, 8

    key = jax.random.PRNGKey(0)
    kx, kskip, kw = jax.random.split(key, 3)

    x = jax.random.normal(kx, (N, in_size, Hin, Win), jnp.float32)
    skip = jax.random.normal(kskip, (N, out_size, 2 * Hin, 2 * Win), jnp.float32)
    w = 0.1 * jax.random.normal(kw, (in_size, out_size, 4, 4), jnp.float32)

    # Deterministic BatchNorm parameters / running stats (eval-mode semantics).
    gamma = 1.0 + 0.05 * jnp.arange(out_size, dtype=jnp.float32)
    beta = 0.01 * jnp.arange(out_size, dtype=jnp.float32)
    run_mean = 0.02 * jnp.arange(out_size, dtype=jnp.float32)
    run_var = 1.0 + 0.1 * jnp.arange(out_size, dtype=jnp.float32)

    out = unet_up_forward(x, skip, w, gamma, beta, run_mean, run_var)
    out = jax.block_until_ready(out)

    ref = jax.block_until_ready(reference(x, skip, w, gamma, beta, run_mean, run_var))
    assert out.shape == (N, 2 * out_size, 2 * Hin, 2 * Win), out.shape
    np.testing.assert_allclose(np.asarray(out), np.asarray(ref), atol=1e-2, rtol=1e-2)

    print("KERNEL_OK")
</pallas_src>

<mosaic_0001>
module attributes {stable_mosaic.version = 11 : i64} {
  func.func @unet_up_kernel(%arg0: i32, %arg1: i32, %arg2: memref<96x128xbf16, #tpu.memory_space<vmem>>, %arg3: memref<128x256xbf16, #tpu.memory_space<vmem>>, %arg4: memref<1x256xf32, #tpu.memory_space<vmem>>, %arg5: memref<1x256xf32, #tpu.memory_space<vmem>>, %arg6: memref<96x256xbf16, #tpu.memory_space<vmem>>) attributes {dimension_semantics = [#tpu.dimension_semantics<parallel>, #tpu.dimension_semantics<parallel>], iteration_bounds = array<i64: 2, 1>, scalar_prefetch = 0 : i64, scratch_operands = 0 : i64, tpu.core_type = #tpu.core_type<tc>, window_params = [{transform_indices = @transform_0, window_bounds = array<i64: 96, 128>}, {pipeline_mode = #tpu.pipeline_mode<synchronous>, transform_indices = @transform_1, window_bounds = array<i64: 128, 256>}, {pipeline_mode = #tpu.pipeline_mode<synchronous>, transform_indices = @transform_2, window_bounds = array<i64: 1, 256>}, {pipeline_mode = #tpu.pipeline_mode<synchronous>, transform_indices = @transform_3, window_bounds = array<i64: 1, 256>}, {transform_indices = @transform_4, window_bounds = array<i64: 96, 256>}]} {
    %c0 = arith.constant 0 : index
    %c0_0 = arith.constant 0 : index
    %0 = vector.load %arg2[%c0, %c0_0] : memref<96x128xbf16, #tpu.memory_space<vmem>>, vector<96x128xbf16>
    %c0_1 = arith.constant 0 : index
    %c0_2 = arith.constant 0 : index
    %1 = vector.load %arg3[%c0_1, %c0_2] : memref<128x256xbf16, #tpu.memory_space<vmem>>, vector<128x256xbf16>
    %cst = arith.constant dense<0.000000e+00> : vector<96x256xf32>
    %2 = tpu.matmul %0, %1, %cst {dimension_numbers = #tpu.dot_dimension_numbers<[1], [0], [0], [1], [0, 0, 1, 1], [], []>} : vector<96x128xbf16>, vector<128x256xbf16>, vector<96x256xf32> -> vector<96x256xf32>
    %c0_3 = arith.constant 0 : index
    %c0_4 = arith.constant 0 : index
    %3 = vector.load %arg4[%c0_3, %c0_4] : memref<1x256xf32, #tpu.memory_space<vmem>>, vector<1x256xf32>
    %4 = vector.broadcast %3 : vector<1x256xf32> to vector<96x256xf32>
    %5 = arith.mulf %2, %4 : vector<96x256xf32>
    %c0_5 = arith.constant 0 : index
    %c0_6 = arith.constant 0 : index
    %6 = vector.load %arg5[%c0_5, %c0_6] : memref<1x256xf32, #tpu.memory_space<vmem>>, vector<1x256xf32>
    %7 = vector.broadcast %6 : vector<1x256xf32> to vector<96x256xf32>
    %8 = arith.addf %5, %7 : vector<96x256xf32>
    %cst_7 = arith.constant 0.000000e+00 : f32
    %9 = vector.broadcast %cst_7 : f32 to vector<96x256xf32>
    %10 = arith.maximumf %8, %9 : vector<96x256xf32>
    %11 = arith.truncf %10 : vector<96x256xf32> to vector<96x256xbf16>
    %c0_8 = arith.constant 0 : index
    %c0_9 = arith.constant 0 : index
    %12 = vector.load %arg6[%c0_8, %c0_9] : memref<96x256xbf16, #tpu.memory_space<vmem>>, vector<96x256xbf16>
    tpu.vector_store %arg6[%c0_8, %c0_9], %11 {strides = array<i32>} : memref<96x256xbf16, #tpu.memory_space<vmem>>, vector<96x256xbf16>,
    return
  }
  func.func @transform_0(%arg0: i32, %arg1: i32) -> (i32, i32) {
    %c0_i32 = arith.constant 0 : i32
    %c0_i32_0 = arith.constant 0 : i32
    return %arg0, %c0_i32 : i32, i32
  }
  func.func @transform_1(%arg0: i32, %arg1: i32) -> (i32, i32) {
    %c0_i32 = arith.constant 0 : i32
    %c0_i32_0 = arith.constant 0 : i32
    return %c0_i32, %arg1 : i32, i32
  }
  func.func @transform_2(%arg0: i32, %arg1: i32) -> (i32, i32) {
    %c0_i32 = arith.constant 0 : i32
    %c0_i32_0 = arith.constant 0 : i32
    return %c0_i32, %arg1 : i32, i32
  }
  func.func @transform_3(%arg0: i32, %arg1: i32) -> (i32, i32) {
    %c0_i32 = arith.constant 0 : i32
    %c0_i32_0 = arith.constant 0 : i32
    return %c0_i32, %arg1 : i32, i32
  }
  func.func @transform_4(%arg0: i32, %arg1: i32) -> (i32, i32) {
    %c0_i32 = arith.constant 0 : i32
    return %arg0, %arg1 : i32, i32
  }
}

</mosaic_0001>

<bundles_post_ra>
// kernel: tpu_custom_call.1
= control target key start
LH: loop header
LB: loop body
LE: loop exit
PB: predicated region body
PF: predicated region fallthrough
CT: control target
= control target key end

     0   :  { %9 = vsyncpa [#allocation3], 0  ;;  %s1523_s0 = inlined_call_operand.hbm [shape: bf16[192,128], index: 0, kind: input, shape index: {}]   ;;  %s1524_s1 = inlined_call_operand.hbm [shape: bf16[128,256], index: 1, kind: input, shape index: {}]   ;;  %s1525_s2 = inlined_call_operand.vmem [shape: f32[1,256], index: 2, kind: input, shape index: {}]   ;;  %s1526_s3 = inlined_call_operand.vmem [shape: f32[1,256], index: 3, kind: input, shape index: {}]   ;;  %s1527_s4 = inlined_call_operand.hbm [shape: bf16[192,256], index: 4, kind: output, shape index: {}]  }
   0x1   :  { %11 = vsyncpa [#allocation3 + $0x1], 0 }
   0x2   :  { %12 = vsyncpa [#allocation6], 0 }
   0x3   :  { %13 = vsyncpa [#allocation4], 0 }
   0x4   :  { %15 = vsyncpa [#allocation4 + $0x1], 0  ;;  %s1224_s15 = smov 0   ;;  %s1226_s16 = smov 0  }
   0x5   :  { %s1228_s17 = smov 0   ;;  %s1230_s18 = smov 0  }
   0x6   :  { %s1232_s19 = smov 0   ;;  %s1234_s20 = smov 0  }
   0x7 LB: > { %s850_s21 = sadd.s32 4294967295, %s1187_s20   ;;  %s851_s22 = sadd.s32 4294967294, %s1187_s20   ;;  %s1187_s20 = sphi %s1234_s20, %s21_s20   ;;  %s1183_s19 = sphi %s1232_s19, %s1550_s19   ;;  %s1179_s18 = sphi %s1230_s18, %s1549_s18   ;;  %s1175_s17 = sphi %s1228_s17, %s1548_s17   ;;  %s1171_s16 = sphi %s1226_s16, %s1547_s16   ;;  %s1167_s15 = sphi %s1224_s15, %s1546_s15  }
   0x8   : > { %p53_p0 = scmp.ne.s32.totalorder %s1171_s16, %s1167_s15  ;;  %p1258_p1 = scmp.eq.s32.totalorder %s850_s21, 0 }
   0x9   : > { %p1262_p2 = scmp.eq.s32.totalorder %s850_s21, 1  ;;  %p163_p3 = scmp.eq.s32.totalorder %s851_s22, 1 }
   0xa   : > { %s1532_s23 = scalar_select %p1258_p1, 1, 0 }
   0xb   : > { %s1533_s24 = scalar_select %p1262_p2, 1, 0 }
   0xc   : > { %p1268_p4 = por %p1258_p1, %p53_p0  ;;  %p852_p5 = scmp.ge.s32.totalorder %s1187_s20, 1 }
   0xd   : > { %p1273_p6 = por %p163_p3, %p53_p0  ;;  %p170_p7 = scmp.lt.s32.totalorder %s1187_s20, 3 }
   0xe   : > { %s1534_s25 = scalar_select %p1268_p4, 1, 0 }
   0xf   : > { %s1535_s26 = scalar_select %p1273_p6, 1, 0 }
  0x10   : > { %p1278_p8 = pnand %p852_p5, %p170_p7  ;;  %s1189_s28 = smov [#allocation5]  }
  0x11   : > { %s185_s29 = sshll.u32 %s1189_s28, 4  ;;  %s33_s5 = sadd.s32 1, %s1183_s19  ;;  %s186_s29 = int_to_ptr.vmem [resolvable:$true] %s185_s29 }
  0x12   : > { %s1536_s27 = scalar_select %p1278_p8, 1, 0 }
  0x13   : > { %p941_p9 = pneg %p1278_p8  ;;  %s1043_s8 = scalar_lea.hbm %s1524_s1, 2048 }
  0x14   : > { %p1044_p12 = scmp.ne.s32.totalorder %s1524_s1, %s1043_s8  ;;  %p1050_p5 = scmp.lt.u32.totalorder %s1043_s8, %s1524_s1 }
  0x15   : > { %p1287_p11 = pnand %p941_p9, %p1258_p1 }
  0x17   : > { %p1045_p13 = pneg %p1287_p11 }
  0x19   : > { %p1046_p0 = pnand %p1045_p13, %p1044_p12 }
  0x1b   : > { %p1047_p3 = pneg %p1046_p0 }
  0x1d   : > { %p1052_p7 = pnand %p1050_p5, %p1047_p3 }
  0x1f   : > { %1055 = shalt.err (!%p1052_p7)
}
  0x20   : > { %s1056_s13 = scalar_lea.vmem %s186_s29, 2048  ;;  %p1064_p1 = scmp.lt.s32.totalorder %s186_s29, %s186_s29 }
  0x21   : > { %p1057_p9 = scmp.ne.s32.totalorder %s186_s29, %s1056_s13  ;;  %p1065_p4 = scmp.lt.s32.totalorder %s1056_s13, %s1056_s13 }
  0x23   : > { %p1059_p10 = pnand %p1057_p9, %p1045_p13  ;;  %p1066_p8 = por %p1065_p4, %p1064_p1 }
  0x25   : > { %p1060_p6 = pneg %p1059_p10 }
  0x27   : > { %p1067_p2 = pnand %p1066_p8, %p1060_p6 }
  0x29   : > { %1070 = shalt.err (!%p1067_p2)
}
  0x2a   : > { %s1190_s14 = smov 128   ;;  %s1191_s21 = smov 8  }
  0x2b   : > { %944 = dma.hbm_to_vmem [thread:$0]  (!%p1287_p11), %s1524_s1, 2048, %s186_s29, [#allocation6], %s1190_s14, %s1190_s14, %s1191_s21  }
  0x2c   : > { %p35_p1 = scmp.ge.s32.totalorder %s33_s5, 2  ;;  %s40_s6 = sadd.s32 1, %s1175_s17 }
  0x2d   : > { %p47_p2 = scmp.ne.s32.totalorder %s1175_s17, %s1171_s16  ;;  %p48_p4 = scmp.eq.s32.totalorder %s1187_s20, 0 }
  0x2e   : > { %s1552_s5 = smov (%p35_p1, %s33_s5), 0  ;;  %p1538_p8 = scmp.ne.s32.totalorder %s1533_s24, 0 }
  0x2f   : > { %p49_p6 = por %p48_p4, %p47_p2  ;;  %s37_s8 = ssub.s32 %s1183_s19, %s1552_s5 }
  0x30   : > { %p1316_p10 = por %p1538_p8, %p47_p2  ;;  %p954_p12 = scmp.lt.s32.totalorder %s1187_s20, 2 }
  0x31   : > { %p38_p13 = scmp.eq.s32.totalorder %s37_s8, 0  ;;  %s215_s30 = sand.u32 1, %s1175_s17  }
  0x32   : > { %s930_s9 = smul.u32 48, %s215_s30  ;;  %p1328_p11 = pnand %p954_p12, %p49_p6 }
  0x33   : > { %s1325_s10 = scalar_select %p38_p13, %s1175_s17, %s40_s6  }
  0x34   : > { %s898_s29 = smul.u32 768, %s1183_s19  ;;  %s219_s11 = scalar_lea.vmem [#allocation2], %s930_s9 }
  0x35   : > { %s226_s12 = sshll.u32 %s219_s11, 4  ;;  %s1339_s22 = scalar_lea.sflag [#allocation3], %s215_s30  ;;  %s1337_s12 = int_to_ptr.vmem [resolvable:$true] %s226_s12 }
  0x36   : > { %s1335_s21 = scalar_lea.hbm %s1523_s0, %s898_s29  ;;  %p1073_p3 = pneg %p1328_p11 }
  0x37   : > { %s1071_s28 = scalar_lea.hbm %s1335_s21, 768  ;;  %s1076_s9 = scalar_lea.hbm %s1523_s0, 1536 }
  0x38   : > { %p1072_p0 = scmp.ne.s32.totalorder %s1335_s21, %s1071_s28  ;;  %p1077_p9 = scmp.lt.u32.totalorder %s1335_s21, %s1523_s0 }
  0x39   : > { %p1078_p1 = scmp.lt.u32.totalorder %s1076_s9, %s1071_s28  ;;  %p1080_p4 = scmp.lt.u32.totalorder %s1071_s28, %s1335_s21 }
  0x3a   : > { %p1074_p5 = pnand %p1073_p3, %p1072_p0 }
  0x3b   : > { %p1079_p2 = por %p1078_p1, %p1077_p9 }
  0x3c   : > { %p1075_p7 = pneg %p1074_p5 }
  0x3d   : > { %p1081_p6 = por %p1080_p4, %p1079_p2 }
  0x3f   : > { %p1082_p8 = pnand %p1081_p6, %p1075_p7 }
  0x41   : > { %1085 = shalt.err (!%p1082_p8)
}
  0x42   : > { %s1086_s30 = scalar_lea.vmem %s1337_s12, 768  ;;  %s1192_s14 = smov [#allocation2]  }
  0x43   : > { %p1087_p12 = scmp.ne.s32.totalorder %s1337_s12, %s1086_s30  ;;  %s1091_s24 = sshll.u32 %s1192_s14, 4  ;;  %s1092_s24 = int_to_ptr.vmem [resolvable:$false] %s1091_s24 }
  0x44   : > { %s1093_s6 = scalar_lea.vmem %s1092_s24, 1536  ;;  %p1094_p5 = scmp.lt.s32.totalorder %s1337_s12, %s1092_s24 }
  0x45   : > { %p1089_p13 = pnand %p1087_p12, %p1073_p3  ;;  %p1095_p9 = scmp.lt.s32.totalorder %s1093_s6, %s1086_s30 }
  0x47   : > { %p1090_p0 = pneg %p1089_p13  ;;  %p1096_p1 = por %p1095_p9, %p1094_p5 }
  0x49   : > { %p1097_p2 = pnand %p1096_p1, %p1090_p0 }
  0x4b   : > { %1100 = shalt.err (!%p1097_p2)
}
  0x4c   : > { %s1193_s28 = smov 64   ;;  %s1194_s8 = smov 4  }
  0x4d   : > { %948 = dma.hbm_to_vmem [thread:$0]  (!%p1328_p11), %s1335_s21, 768, %s1337_s12, %s1339_s22, %s1193_s28, %s1193_s28, %s1194_s8  }
  0x4e   : > { %p1541_p3 = scmp.ne.s32.totalorder %s1536_s27, 0 }
  0x4f   : > { %s1370_s9 = sand.u32 (!%p1541_p3), 1, %s1171_s16   ;;  %p1542_p7 = scmp.ne.s32.totalorder (!%p1541_p3), %s1534_s25, 0 }
  0x50   : > { %238 = sbr.rel (%p1541_p3) target bundleno = 380 (0x17c), region = 36  ;;  %s241_s11 = scalar_lea.sflag (!%p1541_p3), [#allocation3], %s1370_s9 }
  0x51   : > { %s931_s29 = smul.u32 (!%p1541_p3), 48, %s1370_s9 }
  0x53   : > { %s1374_s30 = scalar_lea.vmem (!%p1541_p3), [#allocation2], %s931_s29 }
  0x57   : > { %1154 = dma.done.wait (%p1542_p7), %s241_s11, 768  }
  0x58   : > { %1156 = vsyncadd (%p1542_p7), %s241_s11, 4294966528  ;;  %p1543_p11 = scmp.ne.s32.totalorder %s1532_s23, 0 }
  0x5a   : > { %1158 = dma.done.wait (%p1543_p11), [#allocation6], 2048  }
  0x5b   : > { %1160 = vsyncadd (%p1543_p11), [#allocation6], 4294965248  ;;  %v1195_v0 = vmov 0   ;;  %v1013_v1 = vld [vmem:[#allocation5 + $0x4] ss:$8 sps:$4 sm:$0xff]   ;;  %v535_v23 = vlaneseq  ;;  %s932_s13 = smul.u32 96, %s1370_s9 }
  0x5c   : > { %472 = vmatprep.mubr.bf16.mxu0 %v1195_v0  ;;  %502 = vmatprep.mubr.bf16.mxu1 %v1195_v0  ;;  %v1015_v2 = vld [vmem:[#allocation5] ss:$8 sps:$4 sm:$0xff]   ;;  %v1016_v3 = vld [vmem:[#allocation5 + $0x14] ss:$8 sps:$4 sm:$0xff]   ;;  %v1018_v4 = vld [vmem:[#allocation5 + $0x10] ss:$8 sps:$4 sm:$0xff]  }
  0x5d   : > { %440 = vmatprep.subr.bf16.mxu0 %v1013_v1  ;;  %914 = vmatprep.subr.bf16.mxu1 %v1013_v1  ;;  %v1019_v5 = vld [vmem:[#allocation5 + $0x24] ss:$8 sps:$4 sm:$0xff]   ;;  %v1021_v6 = vld [vmem:[#allocation5 + $0x20] ss:$8 sps:$4 sm:$0xff]   ;;  %v1022_v7 = vld [vmem:[#allocation5 + $0x34] ss:$8 sps:$4 sm:$0xff]  }
  0x5e   : > { %441 = vmatpush1.bf16.msra.mxu0 %v1015_v2  ;;  %922 = vmatpush1.bf16.msra.mxu1 %v1015_v2  ;;  %v1024_v8 = vld [vmem:[#allocation5 + $0x30] ss:$8 sps:$4 sm:$0xff]   ;;  %v1025_v9 = vld [vmem:[#allocation5 + $0x44] ss:$8 sps:$4 sm:$0xff]   ;;  %v1027_v10 = vld [vmem:[#allocation5 + $0x40] ss:$8 sps:$4 sm:$0xff]  }
  0x5f   : > { %442 = vmatprep.subr.bf16.mxu0 %v1016_v3  ;;  %915 = vmatprep.subr.bf16.mxu1 %v1016_v3  ;;  %v1028_v11 = vld [vmem:[#allocation5 + $0x54] ss:$8 sps:$4 sm:$0xff]   ;;  %v1030_v12 = vld [vmem:[#allocation5 + $0x50] ss:$8 sps:$4 sm:$0xff]   ;;  %v1031_v13 = vld [vmem:[#allocation5 + $0x64] ss:$8 sps:$4 sm:$0xff]  }
  0x60   : > { %v1033_v14 = vld [vmem:[#allocation5 + $0x60] ss:$8 sps:$4 sm:$0xff]   ;;  %v1034_v15 = vld [vmem:[#allocation5 + $0x74] ss:$8 sps:$4 sm:$0xff]   ;;  %v1036_v16 = vld [vmem:[#allocation5 + $0x70] ss:$8 sps:$4 sm:$0xff]  }
  0x61   : > { %v1037_v17 = vld [vmem:[%s1374_s30] sm:$0xff]   ;;  %v1038_v18 = vld [vmem:[%s1374_s30 + $0x18] sm:$0xff]   ;;  %v1039_v19 = vld [vmem:[%s1374_s30 + $0x8] sm:$0xff]   ;;  %v536_v24 = vshrl.u32 %v535_v23, 7  ;;  %s1423_s21 = scalar_lea.vmem [#allocation7], %s932_s13  ;;  %s913_s22 = smul.u32 1536, %s1179_s18 }
  0x62   : > { %443 = vmatpush1.bf16.msra.mxu0 %v1018_v4  ;;  %923 = vmatpush1.bf16.msra.mxu1 %v1018_v4  ;;  %v1040_v20 = vld [vmem:[%s1374_s30 + $0x20] sm:$0xff]   ;;  %v1041_v21 = vld [vmem:[%s1374_s30 + $0x10] sm:$0xff]   ;;  %v1042_v22 = vld [vmem:[%s1374_s30 + $0x28] sm:$0xff]   ;;  %s730_s14 = sshll.u32 %s1423_s21, 4  ;;  %s714_s28 = scalar_lea.sflag [#allocation4], %s1370_s9  ;;  %s1470_s14 = int_to_ptr.vmem [resolvable:$true] %s730_s14 }
  0x63   : > { %444 = vmatprep.subr.bf16.mxu0 %v1019_v5  ;;  %916 = vmatprep.subr.bf16.mxu1 %v1019_v5  ;;  %v537_v25 = vsub.s32 0, %v536_v24  ;;  %v533_v26 = vld [vmem:[%s1525_s2] sm:$0x3]  ;;  %v541_v27 = vsub.s32 1, %v536_v24  ;;  %s1468_s18 = scalar_lea.hbm %s1527_s4, %s913_s22  ;;  %s1101_s8 = scalar_lea.vmem %s1470_s14, 1536 }
  0x64   : > { %v569_v28 = vld [vmem:[%s1526_s3] sm:$0x3]  ;;  %p1102_p4 = scmp.ne.s32.totalorder %s1470_s14, %s1101_s8  ;;  %s1196_s29 = smov [#allocation7]  }
  0x65   : > { %v1396_v29 = vrot.slane %v533_v26, %v537_v25  ;;  %v1398_v30 = vrot.slane %v533_v26, %v541_v27  ;;  %v1400_v31 = vrot.slane %v569_v28, %v537_v25  ;;  %v1402_v34 = vrot.slane %v569_v28, %v541_v27  ;;  %s1105_s11 = sshll.u32 %s1196_s29, 4  ;;  %s1106_s11 = int_to_ptr.vmem [resolvable:$false] %s1105_s11 }
  0x66   : > { %445 = vmatpush1.bf16.msra.mxu0 %v1021_v6  ;;  %924 = vmatpush1.bf16.msra.mxu1 %v1021_v6  ;;  %p1103_p6 = pnand %p1102_p4, %p1316_p10  ;;  %s1107_s30 = scalar_lea.vmem %s1106_s11, 3072 }
  0x67   : > { %446 = vmatprep.subr.bf16.mxu0 %v1022_v7  ;;  %917 = vmatprep.subr.bf16.mxu1 %v1022_v7  ;;  %p1108_p12 = scmp.lt.s32.totalorder %s1470_s14, %s1106_s11  ;;  %p1109_p13 = scmp.lt.s32.totalorder %s1107_s30, %s1101_s8 }
  0x68   : > { %p1104_p8 = pneg %p1103_p6 }
  0x69   : > { %p1110_p0 = por %p1109_p13, %p1108_p12 }
  0x6a   : > { %447 = vmatpush1.bf16.msra.mxu0 %v1024_v8  ;;  %925 = vmatpush1.bf16.msra.mxu1 %v1024_v8 }
  0x6b   : > { %448 = vmatprep.subr.bf16.mxu0 %v1025_v9  ;;  %918 = vmatprep.subr.bf16.mxu1 %v1025_v9  ;;  %p1111_p5 = pnand %p1110_p0, %p1104_p8 }
  0x6e   : > { %449 = vmatpush1.bf16.msra.mxu0 %v1027_v10  ;;  %926 = vmatpush1.bf16.msra.mxu1 %v1027_v10 }
  0x6f   : > { %450 = vmatprep.subr.bf16.mxu0 %v1028_v11  ;;  %919 = vmatprep.subr.bf16.mxu1 %v1028_v11 }
  0x72   : > { %451 = vmatpush1.bf16.msra.mxu0 %v1030_v12  ;;  %927 = vmatpush1.bf16.msra.mxu1 %v1030_v12 }
  0x73   : > { %452 = vmatprep.subr.bf16.mxu0 %v1031_v13  ;;  %920 = vmatprep.subr.bf16.mxu1 %v1031_v13 }
  0x76   : > { %453 = vmatpush1.bf16.msra.mxu0 %v1033_v14  ;;  %928 = vmatpush1.bf16.msra.mxu1 %v1033_v14 }
  0x77   : > { %454 = vmatprep.subr.bf16.mxu0 %v1034_v15  ;;  %921 = vmatprep.subr.bf16.mxu1 %v1034_v15 }
  0x7a   : > { %455 = vmatpush1.bf16.msra.mxu0 %v1036_v16  ;;  %929 = vmatpush1.bf16.msra.mxu1 %v1036_v16 }
  0x7d   : > { %473 = vmatmul.mubr.bf16.vlgmr.msra.gmra.mrb[0].mxu0 %v1037_v17  ;;  %503 = vmatmul.mubr.bf16.vlgmr.msra.gmra.mrb[0].mxu1 %v1038_v18 }
  0x7e   : > { %482 = vmatprep.mubr.bf16.mxu0 %v1195_v0  ;;  %512 = vmatprep.mubr.bf16.mxu1 %v1195_v0 }
  0x85   : > { %483 = vmatmul.mubr.bf16.gmra.mrb[4].mxu0 %v1039_v19  ;;  %513 = vmatmul.mubr.bf16.gmra.mrb[4].mxu1 %v1040_v20 }
  0x86   : > { %492 = vmatprep.mubr.bf16.mxu0 %v1195_v0  ;;  %522 = vmatprep.mubr.bf16.mxu1 %v1195_v0 }
  0x8d   : > { %493 = vmatmul.mubr.bf16.gmra.mrb[8].mxu0 %v1041_v21  ;;  %523 = vmatmul.mubr.bf16.gmra.mrb[8].mxu1 %v1042_v22 }
 0x150   : > { %v474_v32 = vpop.f32.mrb[0].mxu0  ;;  %v504_v33 = vpop.f32.mrb[0].mxu1 }
 0x151   : > { %v545_v35 = vmul.f32 %v1396_v29, %v474_v32  ;;  %v557_v36 = vmul.f32 %v1396_v29, %v504_v33  ;;  %v476_v37 = vpop.f32.mrb[1].mxu0  ;;  %v506_v38 = vpop.f32.mrb[1].mxu1 }
 0x152   : > { %v546_v39 = vmul.f32 %v1398_v30, %v476_v37  ;;  %v558_v40 = vmul.f32 %v1398_v30, %v506_v38  ;;  %v478_v41 = vpop.f32.mrb[2].mxu0  ;;  %v508_v42 = vpop.f32.mrb[2].mxu1 }
 0x153   : > { %v581_v43 = vadd.f32 %v1400_v31, %v545_v35  ;;  %v593_v44 = vadd.f32 %v1400_v31, %v557_v36  ;;  %v547_v45 = vmul.f32 %v1396_v29, %v478_v41  ;;  %v559_v46 = vmul.f32 %v1396_v29, %v508_v42  ;;  %v480_v47 = vpop.f32.mrb[3].mxu0  ;;  %v510_v48 = vpop.f32.mrb[3].mxu1 }
 0x154   : > { %v582_v49 = vadd.f32 %v1402_v34, %v546_v39  ;;  %v594_v50 = vadd.f32 %v1402_v34, %v558_v40  ;;  %v548_v51 = vmul.f32 %v1398_v30, %v480_v47  ;;  %v560_v52 = vmul.f32 %v1398_v30, %v510_v48 }
 0x155   : > { %v605_v53 = vmax.f32 %v581_v43, 0.0  ;;  %v617_v54 = vmax.f32 %v593_v44, 0.0  ;;  %v583_v55 = vadd.f32 %v1400_v31, %v547_v45  ;;  %v595_v56 = vadd.f32 %v1400_v31, %v559_v46 }
 0x156   : > { %v606_v57 = vmax.f32 %v582_v49, 0.0  ;;  %v618_v58 = vmax.f32 %v594_v50, 0.0  ;;  %v584_v59 = vadd.f32 %v1402_v34, %v548_v51  ;;  %v596_v60 = vadd.f32 %v1402_v34, %v560_v52 }
 0x157   : > { %v607_v61 = vmax.f32 %v583_v55, 0.0  ;;  %v619_v62 = vmax.f32 %v595_v56, 0.0 }
 0x158   : > { %v899_v63 = vpack.c.bf16 %v606_v57, %v605_v53  ;;  %v905_v0 = vpack.c.bf16 %v618_v58, %v617_v54  ;;  %v608_v1 = vmax.f32 %v584_v59, 0.0  ;;  %v620_v2 = vmax.f32 %v596_v60, 0.0  ;;  %v484_v3 = vpop.f32.mrb[4].mxu0  ;;  %v514_v4 = vpop.f32.mrb[4].mxu1 }
 0x159   : > { %v549_v5 = vmul.f32 %v1396_v29, %v484_v3  ;;  %v561_v6 = vmul.f32 %v1396_v29, %v514_v4  ;;  %v486_v7 = vpop.f32.mrb[5].mxu0  ;;  %v516_v8 = vpop.f32.mrb[5].mxu1 }
 0x15a   : > { %701 = vst [vmem:[%s1423_s21] sm:$0xff] %v899_v63  ;;  %707 = vst [vmem:[%s1423_s21 + $0x30] sm:$0xff] %v905_v0  ;;  %v900_v9 = vpack.c.bf16 %v608_v1, %v607_v61  ;;  %v906_v10 = vpack.c.bf16 %v620_v2, %v619_v62  ;;  %v550_v11 = vmul.f32 %v1398_v30, %v486_v7  ;;  %v488_v13 = vpop.f32.mrb[6].mxu0  ;;  %v518_v14 = vpop.f32.mrb[6].mxu1 }
 0x15b   : > { %v562_v12 = vmul.f32 %v1398_v30, %v516_v8  ;;  %v585_v15 = vadd.f32 %v1400_v31, %v549_v5  ;;  %v597_v16 = vadd.f32 %v1400_v31, %v561_v6  ;;  %v551_v17 = vmul.f32 %v1396_v29, %v488_v13  ;;  %v490_v19 = vpop.f32.mrb[7].mxu0  ;;  %v520_v20 = vpop.f32.mrb[7].mxu1 }
 0x15c   : > { %v563_v18 = vmul.f32 %v1396_v29, %v518_v14  ;;  %702 = vst [vmem:[%s1423_s21 + $0x8] sm:$0xff] %v900_v9  ;;  %708 = vst [vmem:[%s1423_s21 + $0x38] sm:$0xff] %v906_v10  ;;  %v586_v21 = vadd.f32 %v1402_v34, %v550_v11  ;;  %v552_v23 = vmul.f32 %v1398_v30, %v490_v19 }
 0x15d   : > { %v598_v22 = vadd.f32 %v1402_v34, %v562_v12  ;;  %v564_v24 = vmul.f32 %v1398_v30, %v520_v20  ;;  %v609_v25 = vmax.f32 %v585_v15, 0.0  ;;  %v621_v26 = vmax.f32 %v597_v16, 0.0 }
 0x15e   : > { %v587_v27 = vadd.f32 %v1400_v31, %v551_v17  ;;  %v599_v28 = vadd.f32 %v1400_v31, %v563_v18  ;;  %v610_v32 = vmax.f32 %v586_v21, 0.0  ;;  %v588_v35 = vadd.f32 %v1402_v34, %v552_v23 }
 0x15f   : > { %v622_v33 = vmax.f32 %v598_v22, 0.0  ;;  %v600_v36 = vadd.f32 %v1402_v34, %v564_v24 }
 0x160   : > { %v611_v37 = vmax.f32 %v587_v27, 0.0  ;;  %v623_v38 = vmax.f32 %v599_v28, 0.0  ;;  %v901_v39 = vpack.c.bf16 %v610_v32, %v609_v25  ;;  %v612_v41 = vmax.f32 %v588_v35, 0.0  ;;  %v494_v43 = vpop.f32.mrb[8].mxu0  ;;  %v524_v44 = vpop.f32.mrb[8].mxu1 }
 0x161   : > { %v907_v40 = vpack.c.bf16 %v622_v33, %v621_v26  ;;  %v624_v42 = vmax.f32 %v600_v36, 0.0  ;;  %v553_v45 = vmul.f32 %v1396_v29, %v494_v43  ;;  %v565_v46 = vmul.f32 %v1396_v29, %v524_v44  ;;  %v496_v47 = vpop.f32.mrb[9].mxu0  ;;  %v526_v48 = vpop.f32.mrb[9].mxu1 }
 0x162   : > { %703 = vst [vmem:[%s1423_s21 + $0x10] sm:$0xff] %v901_v39  ;;  %v902_v49 = vpack.c.bf16 %v612_v41, %v611_v37  ;;  %v554_v51 = vmul.f32 %v1398_v30, %v496_v47  ;;  %v566_v52 = vmul.f32 %v1398_v30, %v526_v48  ;;  %v498_v53 = vpop.f32.mrb[10].mxu0  ;;  %v528_v54 = vpop.f32.mrb[10].mxu1 }
 0x163   : > { %709 = vst [vmem:[%s1423_s21 + $0x40] sm:$0xff] %v907_v40  ;;  %v908_v50 = vpack.c.bf16 %v624_v42, %v623_v38  ;;  %v589_v55 = vadd.f32 %v1400_v31, %v553_v45  ;;  %v601_v56 = vadd.f32 %v1400_v31, %v565_v46  ;;  %v555_v57 = vmul.f32 %v1396_v29, %v498_v53  ;;  %v500_v59 = vpop.f32.mrb[11].mxu0  ;;  %v530_v60 = vpop.f32.mrb[11].mxu1 }
 0x164   : > { %v567_v58 = vmul.f32 %v1396_v29, %v528_v54  ;;  %704 = vst [vmem:[%s1423_s21 + $0x18] sm:$0xff] %v902_v49  ;;  %v590_v61 = vadd.f32 %v1402_v34, %v554_v51  ;;  %v602_v62 = vadd.f32 %v1402_v34, %v566_v52  ;;  %v556_v63 = vmul.f32 %v1398_v30, %v500_v59 }
 0x165   : > { %710 = vst [vmem:[%s1423_s21 + $0x48] sm:$0xff] %v908_v50  ;;  %v568_v0 = vmul.f32 %v1398_v30, %v530_v60  ;;  %v613_v1 = vmax.f32 %v589_v55, 0.0  ;;  %v625_v2 = vmax.f32 %v601_v56, 0.0  ;;  %v591_v3 = vadd.f32 %v1400_v31, %v555_v57 }
 0x166   : > { %v603_v29 = vadd.f32 %v1400_v31, %v567_v58  ;;  %v614_v4 = vmax.f32 %v590_v61, 0.0  ;;  %v626_v5 = vmax.f32 %v602_v62, 0.0  ;;  %v592_v6 = vadd.f32 %v1402_v34, %v556_v63 }
 0x167   : > { %v604_v7 = vadd.f32 %v1402_v34, %v568_v0  ;;  %v615_v30 = vmax.f32 %v591_v3, 0.0 }
 0x168   : > { %v627_v8 = vmax.f32 %v603_v29, 0.0  ;;  %v903_v9 = vpack.c.bf16 %v614_v4, %v613_v1  ;;  %v909_v10 = vpack.c.bf16 %v626_v5, %v625_v2  ;;  %v616_v11 = vmax.f32 %v592_v6, 0.0 }
 0x169   : > { %v628_v12 = vmax.f32 %v604_v7, 0.0 }
 0x16a   : > { %705 = vst [vmem:[%s1423_s21 + $0x20] sm:$0xff] %v903_v9  ;;  %711 = vst [vmem:[%s1423_s21 + $0x50] sm:$0xff] %v909_v10  ;;  %v904_v31 = vpack.c.bf16 %v616_v11, %v615_v30 }
 0x16b   : > { %v910_v34 = vpack.c.bf16 %v628_v12, %v627_v8 }
 0x16c   : > { %706 = vst [vmem:[%s1423_s21 + $0x28] sm:$0xff] %v904_v31 }
 0x16d   : > { %712 = vst [vmem:[%s1423_s21 + $0x58] sm:$0xff] %v910_v34 }
 0x16e   : > { %1114 = shalt.err (!%p1111_p5)
}
 0x16f   : > { %s1115_s23 = scalar_lea.hbm %s1468_s18, 1536  ;;  %s1119_s12 = scalar_lea.hbm %s1527_s4, 3072 }
 0x170   : > { %p1116_p9 = scmp.ne.s32.totalorder %s1468_s18, %s1115_s23  ;;  %p1120_p3 = scmp.lt.u32.totalorder %s1468_s18, %s1527_s4 }
 0x171   : > { %p1121_p7 = scmp.lt.u32.totalorder %s1119_s12, %s1115_s23  ;;  %p1123_p4 = scmp.lt.u32.totalorder %s1115_s23, %s1468_s18 }
 0x172   : > { %p1117_p1 = pnand %p1116_p9, %p1316_p10 }
 0x173   : > { %p1122_p11 = por %p1121_p7, %p1120_p3 }
 0x174   : > { %p1118_p2 = pneg %p1117_p1 }
 0x175   : > { %p1124_p6 = por %p1123_p4, %p1122_p11 }
 0x177   : > { %p1125_p8 = pnand %p1124_p6, %p1118_p2 }
 0x179   : > { %1128 = shalt.err (!%p1125_p8)
}
 0x17a   : > { %s1197_s22 = smov 128   ;;  %s1198_s24 = smov 8  }
 0x17b   : > { %939 = dma.vmem_to_hbm [thread:$0]  (%p1316_p10), %s1470_s14, 1536, %s1468_s18, %s714_s28, %s1197_s22, %s1197_s22, %s1198_s24  }
 0x17c PF: > { %s745_s6 = sand.u32 1, %s1167_s15   ;;  %p1544_p12 = scmp.ne.s32.totalorder %s1535_s26, 0 }
 0x17d   : > { %p1545_p13 = scmp.ge.s32.totalorder %s1187_s20, 2  ;;  %s746_s8 = scalar_lea.sflag [#allocation4], %s745_s6 }
 0x17f   : > { %p950_p0 = pnand %p1545_p13, %p1544_p12 }
 0x181   : > { %1162 = dma.done.wait (!%p950_p0), %s746_s8, 1536  }
 0x182   : > { %1164 = vsyncadd (!%p950_p0), %s746_s8, 4294965760  ;;  %s21_s20 = sadd.s32 1, %s1187_s20   ;;  %s1546_s15 = smov %s1171_s16 }
 0x183   : > { %p18_p5 = scmp.ge.s32.totalorder %s21_s20, 4   ;;  %s1547_s16 = smov %s1175_s17 }
 0x184   : > { %s1548_s17 = smov %s1325_s10  ;;  %s1549_s18 = smov %s1183_s19 }
 0x185   : > { %s1550_s19 = smov %s1552_s5  ;;  %20 = sbr.rel (!%p18_p5) target bundleno = 7 (0x7), region = 92 }
 0x18c   :  { %751 = vsyncpa [#allocation3], 1 }
 0x18d   :  { %753 = vsyncpa [#allocation3 + $0x1], 1 }
 0x18e   :  { %754 = vsyncpa [#allocation6], 1 }
 0x18f   :  { %755 = vsyncpa [#allocation4], 1 }
 0x190   :  { %757 = vsyncpa [#allocation4 + $0x1], 1 }

</bundles_post_ra>
